<compile_context>
chip_gen: v7x
topology: tpu7x:2x2x1
jax: 0.10.0
libtpu: 0.0.40
codegen_flags: <defaults>
</compile_context>

<pallas_src>
import functools

import numpy as np

import jax
import jax.numpy as jnp
from jax.experimental import pallas as pl
from jax.experimental.pallas import tpu as pltpu

LANE = 128                               # lane width: channel dims of aggregation outputs
SUB = 16                                 # bf16 sublane packing granularity
MAX_TILE = 512                           # baseline row / contraction tile for aggregation
TRANSFORM_MAX_ROWS = 1024                # row tile for the X @ W transform
VMEM_LIMIT_BYTES = 48 * 1024 * 1024      # portable across v5e / v6e / v7x
XW_RESIDENT_BUDGET_BYTES = 32 * 1024 * 1024   # keep XW fully VMEM-resident if it fits


def _round_up(v, m):
    return (v + m - 1) // m * m


def _pad2d(a, rows, cols):
    return jnp.pad(a, ((0, rows - a.shape[0]), (0, cols - a.shape[1])))


def _pick_tile(n):
    """Aggregation tile (multiple of 128, <= MAX_TILE) and padded node count."""
    n128 = _round_up(max(n, 1), LANE)
    tile = min(MAX_TILE, n128)
    n_pad = _round_up(n128, tile)
    return tile, n_pad


def _pick_row_tile(n_pad, max_rows=TRANSFORM_MAX_ROWS):
    """Largest multiple-of-128 divisor of n_pad that is <= max_rows."""
    rt = min(max_rows, n_pad)
    while n_pad % rt:
        rt -= LANE
    return rt


# ----------------------------- kernels --------------------------------------


def gcn_transform_kernel(x_ref, w_ref, out_ref):
    # XW = X @ W : bf16 operands, f32 MXU accumulation.
    out_ref[...] = jnp.dot(
        x_ref[...], w_ref[...], preferred_element_type=jnp.float32
    ).astype(out_ref.dtype)


def gcn_aggregate_kernel(kidx_ref, kcnt_ref, a_ref, xw_ref, b_ref, out_ref,
                         acc_ref, *, tk, max_nz, apply_relu, xw_resident):
    # out = A_hat @ XW + b (optionally ReLU), grid = (row tiles, nonzero k
    # tiles of that row, padded to max_nz). Resident f32 accumulator: zero at
    # j==0, bias/ReLU/store at j==last; padded steps (j >= kcnt) do no work.
    i = pl.program_id(0)
    j = pl.program_id(1)

    @pl.when(j == 0)
    def _():
        acc_ref[...] = jnp.zeros_like(acc_ref)

    @pl.when(j < kcnt_ref[i])
    def _():
        if xw_resident:
            off = pl.multiple_of(kidx_ref[i * max_nz + j] * tk, tk)
            xw = xw_ref[pl.ds(off, tk), :]        # slice resident XW (no HBM)
        else:
            xw = xw_ref[...]                      # streamed k-slab fallback
        acc_ref[...] += jnp.dot(a_ref[...], xw,
                                preferred_element_type=jnp.float32)

    @pl.when(j == pl.num_programs(1) - 1)
    def _():
        r = acc_ref[...] + b_ref[...]             # f32 bias add on the VPU
        if apply_relu:                            # static Python flag
            r = jnp.maximum(r, 0.0)
        out_ref[...] = r.astype(out_ref.dtype)


# -------------------------- pallas wrappers ----------------------------------


def _transform(x_pad, w_pad, out_dtype=jnp.bfloat16):
    """Row-tiled X @ W (tiny weight resident, rows streamed, big row tile)."""
    n_pad, cin_pad = x_pad.shape
    cout_pad = w_pad.shape[1]
    rt = _pick_row_tile(n_pad)
    itemsize = jnp.dtype(out_dtype).itemsize
    return pl.pallas_call(
        gcn_transform_kernel,
        out_shape=jax.ShapeDtypeStruct((n_pad, cout_pad), out_dtype),
        grid_spec=pltpu.PrefetchScalarGridSpec(
            num_scalar_prefetch=0,
            grid=(n_pad // rt,),
            in_specs=[
                pl.BlockSpec((rt, cin_pad), lambda i: (i, 0)),
                pl.BlockSpec((cin_pad, cout_pad), lambda i: (0, 0)),
            ],
            out_specs=pl.BlockSpec((rt, cout_pad), lambda i: (i, 0)),
        ),
        compiler_params=pltpu.CompilerParams(
            dimension_semantics=("parallel",),
            vmem_limit_bytes=VMEM_LIMIT_BYTES,
        ),
        cost_estimate=pl.CostEstimate(
            flops=2 * n_pad * cin_pad * cout_pad,
            transcendentals=0,
            bytes_accessed=2 * n_pad * cin_pad
            + 2 * cin_pad * cout_pad
            + itemsize * n_pad * cout_pad,
        ),
    )(x_pad, w_pad)


def _aggregate(a_pad, xw_pad, b_pad, kidx, kcnt, *, tile, max_nz, nnz_tiles,
               apply_relu, out_dtype):
    """Block-sparse tiled A_hat @ XW + b (opt. ReLU), f32 VMEM accumulator."""
    n_pad = a_pad.shape[0]
    c_pad = xw_pad.shape[1]
    nt_i = n_pad // tile
    xw_resident = (2 * n_pad * c_pad) <= XW_RESIDENT_BUDGET_BYTES
    itemsize = jnp.dtype(out_dtype).itemsize

    if xw_resident:
        xw_spec = pl.BlockSpec((n_pad, c_pad), lambda i, j, ks, kc: (0, 0))
        xw_bytes = 2 * n_pad * c_pad
    else:
        # TODO(synk): for very large N, tile the channel dim instead so the
        # XW k-slab stays resident across row tiles.
        xw_spec = pl.BlockSpec(
            (tile, c_pad), lambda i, j, ks, kc: (ks[i * max_nz + j], 0))
        xw_bytes = 2 * nnz_tiles * tile * c_pad

    kernel = functools.partial(
        gcn_aggregate_kernel, tk=tile, max_nz=max_nz,
        apply_relu=apply_relu, xw_resident=xw_resident)

    return pl.pallas_call(
        kernel,
        out_shape=jax.ShapeDtypeStruct((n_pad, c_pad), out_dtype),
        grid_spec=pltpu.PrefetchScalarGridSpec(
            num_scalar_prefetch=2,             # kidx, kcnt -> SMEM
            grid=(nt_i, max_nz),
            in_specs=[
                # A_hat tile: column-tile index comes from prefetched metadata;
                # padded steps repeat the last valid index -> no extra DMA.
                pl.BlockSpec((tile, tile),
                             lambda i, j, ks, kc: (i, ks[i * max_nz + j])),
                xw_spec,
                pl.BlockSpec((1, c_pad), lambda i, j, ks, kc: (0, 0)),  # bias
            ],
            out_specs=pl.BlockSpec((tile, c_pad), lambda i, j, ks, kc: (i, 0)),
            scratch_shapes=[pltpu.VMEM((tile, c_pad), jnp.float32)],
        ),
        compiler_params=pltpu.CompilerParams(
            dimension_semantics=("parallel", "arbitrary"),
            vmem_limit_bytes=VMEM_LIMIT_BYTES,
        ),
        cost_estimate=pl.CostEstimate(
            flops=2 * nnz_tiles * tile * tile * c_pad,
            transcendentals=0,
            bytes_accessed=2 * nnz_tiles * tile * tile   # bf16 A_hat (nz tiles)
            + xw_bytes                                   # bf16 XW
            + itemsize * n_pad * c_pad                   # output
            + 4 * c_pad,                                 # f32 bias
        ),
    )(kidx, kcnt, a_pad, xw_pad, b_pad)


# ----------------------------- graph prep ------------------------------------


def gcn_normalized_adjacency(edge_index, num_nodes):
    """Dense A_hat = D^-1/2 (A + I) D^-1/2, following PyG's gcn_norm."""
    loop = jnp.arange(num_nodes, dtype=edge_index.dtype)
    row = jnp.concatenate([edge_index[0], loop])  # source
    col = jnp.concatenate([edge_index[1], loop])  # target
    ew = jnp.ones(row.shape[0], dtype=jnp.float32)
    deg = jnp.zeros((num_nodes,), jnp.float32).at[col].add(ew)
    deg_inv_sqrt = jnp.where(deg > 0, 1.0 / jnp.sqrt(deg), 0.0)
    norm = deg_inv_sqrt[row] * ew * deg_inv_sqrt[col]
    # aggregation: out[target] += norm * x[source]  =>  A_hat[target, source]
    a_hat = jnp.zeros((num_nodes, num_nodes), jnp.float32).at[col, row].add(norm)
    return a_hat


def prepare_graph(edge_index, num_nodes):
    """Host-side, ONCE per static graph: padded bf16 A_hat + block-sparsity
    metadata (nonzero column-tile indices per row tile). Runs eagerly
    (numpy) — do not jit this function; jit/apply only gnn_encoder_apply."""
    tile, n_pad = _pick_tile(num_nodes)
    a_hat = gcn_normalized_adjacency(edge_index, num_nodes)
    a_f32_pad = np.asarray(_pad2d(a_hat, n_pad, n_pad))
    nt = n_pad // tile

    occ = (a_f32_pad.reshape(nt, tile, nt, tile) != 0.0).any(axis=(1, 3))
    kcnt = occ.sum(axis=1).astype(np.int32)
    max_nz = max(1, int(kcnt.max()))
    kidx = np.zeros((nt, max_nz), np.int32)
    for i in range(nt):
        nz = np.nonzero(occ[i])[0].astype(np.int32)
        if nz.size:
            kidx[i, :nz.size] = nz
            kidx[i, nz.size:] = nz[-1]   # repeat last valid index: padded grid
                                         # steps reuse the resident block (no DMA)
    return {
        "a_pad": jnp.asarray(a_f32_pad, dtype=jnp.bfloat16),
        "kidx": jnp.asarray(kidx.reshape(-1)),   # 1-D to avoid 2-D SMEM padding
        "kcnt": jnp.asarray(kcnt),
        "tile": tile,
        "n_pad": n_pad,
        "max_nz": max_nz,
        "nnz_tiles": int(kcnt.sum()),
        "num_nodes": int(num_nodes),
    }


# ----------------------------- model -----------------------------------------


def gnn_encoder_apply(x, graph, params):
    """Padded / tiled Pallas forward. x: (N, in_ch) f32; graph: prepare_graph()."""
    n, cin = x.shape
    assert n == graph["num_nodes"]
    hid = params["w1"].shape[1]
    cout = params["w2"].shape[1]
    n_pad, tile = graph["n_pad"], graph["tile"]

    cin_pad = _round_up(cin, SUB)       # tiny input dim: sublane pad only
    hid_pad = _round_up(hid, LANE)      # aggregation outputs stay lane-dense
    cout_pad = _round_up(cout, LANE)

    # NOTE on padding correctness: padded rows of H are relu(b1) != 0, but the
    # padded COLUMNS of A_hat and the padded bias entries are exactly zero, so
    # padded rows/cols can never contaminate real rows. Keep it that way.
    x_p = _pad2d(x, n_pad, cin_pad).astype(jnp.bfloat16)
    w1_p = _pad2d(params["w1"], cin_pad, hid_pad).astype(jnp.bfloat16)
    w2_p = _pad2d(params["w2"], hid_pad, cout_pad).astype(jnp.bfloat16)
    b1_p = _pad2d(params["b1"], 1, hid_pad).astype(jnp.float32)
    b2_p = _pad2d(params["b2"], 1, cout_pad).astype(jnp.float32)

    agg = functools.partial(
        _aggregate, kidx=graph["kidx"], kcnt=graph["kcnt"], tile=tile,
        max_nz=graph["max_nz"], nnz_tiles=graph["nnz_tiles"])

    # Layer 1: H = relu(A_hat @ (X @ W1) + b1)   (H kept bf16 for layer-2 MXU)
    xw1 = _transform(x_p, w1_p, out_dtype=jnp.bfloat16)
    h = agg(graph["a_pad"], xw1, b1_p, apply_relu=True, out_dtype=jnp.bfloat16)

    # Layer 2: O = A_hat @ (H @ W2) + b2   (separate call: needs ALL rows of H)
    hw2 = _transform(h, w2_p, out_dtype=jnp.bfloat16)
    o = agg(graph["a_pad"], hw2, b2_p, apply_relu=False, out_dtype=jnp.float32)

    return o[:n, :cout]


def gnn_encoder_forward(x, edge_index, params):
    """Convenience one-shot path. For repeated forwards on a static graph,
    call prepare_graph once and gnn_encoder_apply directly (the dense N^2
    A_hat build + pad + cast + occupancy scan dominates otherwise)."""
    graph = prepare_graph(edge_index, x.shape[0])
    return gnn_encoder_apply(x, graph, params)


def init_params(key, in_channels, hidden_channels, out_channels):
    k1, k2, k3, k4 = jax.random.split(key, 4)

    def glorot(k, fan_in, fan_out):
        lim = jnp.sqrt(6.0 / (fan_in + fan_out))
        return jax.random.uniform(
            k, (fan_in, fan_out), jnp.float32, minval=-lim, maxval=lim
        )

    return {
        "w1": glorot(k1, in_channels, hidden_channels),
        "b1": jax.random.uniform(k2, (1, hidden_channels), jnp.float32, -0.1, 0.1),
        "w2": glorot(k3, hidden_channels, out_channels),
        "b2": jax.random.uniform(k4, (1, out_channels), jnp.float32, -0.1, 0.1),
    }


if __name__ == "__main__":
    key = jax.random.PRNGKey(0)
    kx, ke, kp = jax.random.split(key, 3)

    # Small graph, but large enough (pads to 1024 nodes) to exercise the
    # 512-tile grid, the resident-XW slicing, and the block-sparse metadata.
    num_nodes = 600
    in_channels = 8
    hidden_channels = 32
    out_channels = 16
    num_edges = 2000

    x = jax.random.normal(kx, (num_nodes, in_channels), jnp.float32)
    src = jax.random.randint(ke, (num_edges,), 0, num_nodes, jnp.int32)
    dst = jax.random.randint(
        jax.random.fold_in(ke, 1), (num_edges,), 0, num_nodes, jnp.int32
    )
    edge_index = jnp.stack([src, dst], axis=0)

    params = init_params(kp, in_channels, hidden_channels, out_channels)

    graph = prepare_graph(edge_index, num_nodes)   # hoisted: once per graph
    out = gnn_encoder_apply(x, graph, params)
    jax.block_until_ready(out)

    # Reference check in plain f32 JAX. bf16 matmul operands -> ~0.4% relative
    # error, hence the loosened tolerance (documented, intentional).
    a_hat = gcn_normalized_adjacency(edge_index, num_nodes)
    h_ref = jnp.maximum(a_hat @ (x @ params["w1"]) + params["b1"], 0.0)
    o_ref = a_hat @ (h_ref @ params["w2"]) + params["b2"]
    assert out.shape == (num_nodes, out_channels)
    max_err = float(jnp.max(jnp.abs(out - o_ref)))
    assert jnp.allclose(out, o_ref, atol=5e-2, rtol=5e-2), max_err

    print("KERNEL_OK")
</pallas_src>

<mosaic_0001>
module attributes {stable_mosaic.version = 11 : i64} {
  func.func @gcn_transform_kernel(%arg0: i32, %arg1: memref<1024x16xbf16, #tpu.memory_space<vmem>>, %arg2: memref<16x128xbf16, #tpu.memory_space<vmem>>, %arg3: memref<1024x128xbf16, #tpu.memory_space<vmem>>) attributes {dimension_semantics = [#tpu.dimension_semantics<parallel>], iteration_bounds = array<i64: 1>, scalar_prefetch = 0 : i64, scratch_operands = 0 : i64, tpu.core_type = #tpu.core_type<tc>, window_params = [{transform_indices = @transform_0, window_bounds = array<i64: 1024, 16>}, {pipeline_mode = #tpu.pipeline_mode<synchronous>, transform_indices = @transform_1, window_bounds = array<i64: 16, 128>}, {transform_indices = @transform_2, window_bounds = array<i64: 1024, 128>}]} {
    %c0 = arith.constant 0 : index
    %c0_0 = arith.constant 0 : index
    %0 = vector.load %arg1[%c0, %c0_0] : memref<1024x16xbf16, #tpu.memory_space<vmem>>, vector<1024x16xbf16>
    %c0_1 = arith.constant 0 : index
    %c0_2 = arith.constant 0 : index
    %1 = vector.load %arg2[%c0_1, %c0_2] : memref<16x128xbf16, #tpu.memory_space<vmem>>, vector<16x128xbf16>
    %cst = arith.constant dense<0.000000e+00> : vector<1024x128xf32>
    %2 = tpu.matmul %0, %1, %cst {dimension_numbers = #tpu.dot_dimension_numbers<[1], [0], [0], [1], [0, 0, 1, 1], [], []>} : vector<1024x16xbf16>, vector<16x128xbf16>, vector<1024x128xf32> -> vector<1024x128xf32>
    %3 = arith.truncf %2 : vector<1024x128xf32> to vector<1024x128xbf16>
    %c0_3 = arith.constant 0 : index
    %c0_4 = arith.constant 0 : index
    %4 = vector.load %arg3[%c0_3, %c0_4] : memref<1024x128xbf16, #tpu.memory_space<vmem>>, vector<1024x128xbf16>
    tpu.vector_store %arg3[%c0_3, %c0_4], %3 {strides = array<i32>} : memref<1024x128xbf16, #tpu.memory_space<vmem>>, vector<1024x128xbf16>,
    return
  }
  func.func @transform_0(%arg0: i32) -> (i32, i32) {
    %c0_i32 = arith.constant 0 : i32
    %c0_i32_0 = arith.constant 0 : i32
    return %arg0, %c0_i32 : i32, i32
  }
  func.func @transform_1(%arg0: i32) -> (i32, i32) {
    %c0_i32 = arith.constant 0 : i32
    %c0_i32_0 = arith.constant 0 : i32
    %c0_i32_1 = arith.constant 0 : i32
    return %c0_i32, %c0_i32_0 : i32, i32
  }
  func.func @transform_2(%arg0: i32) -> (i32, i32) {
    %c0_i32 = arith.constant 0 : i32
    %c0_i32_0 = arith.constant 0 : i32
    return %arg0, %c0_i32 : i32, i32
  }
}

</mosaic_0001>

<bundles_post_ra>
// kernel: tpu_custom_call.1
= control target key start
LH: loop header
LB: loop body
LE: loop exit
PB: predicated region body
PF: predicated region fallthrough
CT: control target
= control target key end

     0   :  { %vm469_vm0 = vcmask 130048   ;;  %s3209_s0 = inlined_call_operand.vmem [shape: bf16[1024,16], index: 0, kind: input, shape index: {}]   ;;  %s3210_s1 = inlined_call_operand.vmem [shape: bf16[16,128], index: 1, kind: input, shape index: {}]   ;;  %s3211_s2 = inlined_call_operand.hbm [shape: bf16[1024,128], index: 2, kind: output, shape index: {}]  }
   0x1   :  { %v2831_v0 = vld [vmem:[%s3210_s1] sm:$0xff]   ;;  %v2834_v3 = vld [vmem:[%s3209_s0 + $0x8] sm:$0xff]   ;;  %v2836_v5 = vld [vmem:[%s3209_s0 + $0x10] sm:$0xff]  }
   0x2   :  { %v2832_v1 = vld [vmem:[%s3209_s0] sm:$0xff]   ;;  %2696 = vmatprep.subr.bf16.mxu0 %v2831_v0  ;;  %2826 = vmatprep.subr.bf16.mxu1 %v2831_v0  ;;  %v2835_v4 = vld [vmem:[%s3209_s0 + $0x108] sm:$0xff]   ;;  %v2837_v6 = vld [vmem:[%s3209_s0 + $0x110] sm:$0xff]  }
   0x3   :  { %v2833_v2 = vld [vmem:[%s3209_s0 + $0x100] sm:$0xff]   ;;  %2697 = vmatpush3.bf16.msra.mxu0 %v2831_v0  ;;  %2827 = vmatpush3.bf16.msra.mxu1 %v2831_v0  ;;  %v2838_v7 = vld [vmem:[%s3209_s0 + $0x18] sm:$0xff]   ;;  %v2842_v11 = vld [vmem:[%s3209_s0 + $0x28] sm:$0xff]  }
   0x4   :  { %2698 = vmatprep.mubr.msk.bf16.mxu0 %vm469_vm0, %v2832_v1  ;;  %2762 = vmatprep.mubr.msk.bf16.mxu1 %vm469_vm0, %v2833_v2  ;;  %v2839_v8 = vld [vmem:[%s3209_s0 + $0x118] sm:$0xff]   ;;  %v2840_v9 = vld [vmem:[%s3209_s0 + $0x20] sm:$0xff]   ;;  %v2843_v12 = vld [vmem:[%s3209_s0 + $0x128] sm:$0xff]  }
   0x5   :  { %v2841_v10 = vld [vmem:[%s3209_s0 + $0x120] sm:$0xff]   ;;  %v2844_v13 = vld [vmem:[%s3209_s0 + $0x30] sm:$0xff]   ;;  %v2846_v15 = vld [vmem:[%s3209_s0 + $0x38] sm:$0xff]  }
   0x6   :  { %2699 = vmatmul.mubr.msk.bf16.vlgmr.msra.gmra.mrb[0].mxu0 %vm469_vm0, %v2834_v3  ;;  %2763 = vmatmul.mubr.msk.bf16.vlgmr.msra.gmra.mrb[0].mxu1 %vm469_vm0, %v2835_v4  ;;  %v2845_v14 = vld [vmem:[%s3209_s0 + $0x130] sm:$0xff]   ;;  %v2847_v16 = vld [vmem:[%s3209_s0 + $0x138] sm:$0xff]   ;;  %v2848_v17 = vld [vmem:[%s3209_s0 + $0x40] sm:$0xff]  }
   0x7   :  { %2702 = vmatprep.mubr.msk.bf16.mxu0 %vm469_vm0, %v2836_v5  ;;  %2766 = vmatprep.mubr.msk.bf16.mxu1 %vm469_vm0, %v2837_v6  ;;  %v2849_v18 = vld [vmem:[%s3209_s0 + $0x140] sm:$0xff]   ;;  %v2850_v19 = vld [vmem:[%s3209_s0 + $0x48] sm:$0xff]   ;;  %v2852_v21 = vld [vmem:[%s3209_s0 + $0x50] sm:$0xff]  }
   0x8   :  { %v2851_v20 = vld [vmem:[%s3209_s0 + $0x148] sm:$0xff]   ;;  %v2853_v22 = vld [vmem:[%s3209_s0 + $0x150] sm:$0xff]   ;;  %v2854_v23 = vld [vmem:[%s3209_s0 + $0x58] sm:$0xff]  }
   0x9   :  { %v2855_v24 = vld [vmem:[%s3209_s0 + $0x158] sm:$0xff]   ;;  %v2856_v25 = vld [vmem:[%s3209_s0 + $0x60] sm:$0xff]   ;;  %v2858_v27 = vld [vmem:[%s3209_s0 + $0x68] sm:$0xff]  }
   0xa   :  { %v2857_v26 = vld [vmem:[%s3209_s0 + $0x160] sm:$0xff]   ;;  %v2859_v28 = vld [vmem:[%s3209_s0 + $0x168] sm:$0xff]   ;;  %v2860_v29 = vld [vmem:[%s3209_s0 + $0x70] sm:$0xff]  }
   0xb   :  { %v2861_v30 = vld [vmem:[%s3209_s0 + $0x170] sm:$0xff]   ;;  %v2862_v31 = vld [vmem:[%s3209_s0 + $0x78] sm:$0xff]   ;;  %v2864_v33 = vld [vmem:[%s3209_s0 + $0x80] sm:$0xff]  }
   0xc   :  { %v2863_v32 = vld [vmem:[%s3209_s0 + $0x178] sm:$0xff]   ;;  %v2865_v34 = vld [vmem:[%s3209_s0 + $0x180] sm:$0xff]  }
   0xe   :  { %2703 = vmatmul.mubr.msk.bf16.gmra.mrb[4].mxu0 %vm469_vm0, %v2838_v7  ;;  %2767 = vmatmul.mubr.msk.bf16.gmra.mrb[4].mxu1 %vm469_vm0, %v2839_v8 }
   0xf   :  { %2706 = vmatprep.mubr.msk.bf16.mxu0 %vm469_vm0, %v2840_v9  ;;  %2770 = vmatprep.mubr.msk.bf16.mxu1 %vm469_vm0, %v2841_v10 }
  0x16   :  { %2707 = vmatmul.mubr.msk.bf16.gmra.mrb[8].mxu0 %vm469_vm0, %v2842_v11  ;;  %2771 = vmatmul.mubr.msk.bf16.gmra.mrb[8].mxu1 %vm469_vm0, %v2843_v12 }
  0x17   :  { %2710 = vmatprep.mubr.msk.bf16.mxu0 %vm469_vm0, %v2844_v13  ;;  %2774 = vmatprep.mubr.msk.bf16.mxu1 %vm469_vm0, %v2845_v14 }
  0x1e   :  { %2711 = vmatmul.mubr.msk.bf16.gmra.mrb[12].mxu0 %vm469_vm0, %v2846_v15  ;;  %2775 = vmatmul.mubr.msk.bf16.gmra.mrb[12].mxu1 %vm469_vm0, %v2847_v16 }
  0x1f   :  { %2714 = vmatprep.mubr.msk.bf16.mxu0 %vm469_vm0, %v2848_v17  ;;  %2778 = vmatprep.mubr.msk.bf16.mxu1 %vm469_vm0, %v2849_v18 }
  0x26   :  { %2715 = vmatmul.mubr.msk.bf16.gmra.mrb[16].mxu0 %vm469_vm0, %v2850_v19  ;;  %2779 = vmatmul.mubr.msk.bf16.gmra.mrb[16].mxu1 %vm469_vm0, %v2851_v20 }
  0x27   :  { %2718 = vmatprep.mubr.msk.bf16.mxu0 %vm469_vm0, %v2852_v21  ;;  %2782 = vmatprep.mubr.msk.bf16.mxu1 %vm469_vm0, %v2853_v22 }
  0x2e   :  { %2719 = vmatmul.mubr.msk.bf16.gmra.mrb[20].mxu0 %vm469_vm0, %v2854_v23  ;;  %2783 = vmatmul.mubr.msk.bf16.gmra.mrb[20].mxu1 %vm469_vm0, %v2855_v24 }
  0x2f   :  { %2722 = vmatprep.mubr.msk.bf16.mxu0 %vm469_vm0, %v2856_v25  ;;  %2786 = vmatprep.mubr.msk.bf16.mxu1 %vm469_vm0, %v2857_v26 }
  0x36   :  { %2723 = vmatmul.mubr.msk.bf16.gmra.mrb[24].mxu0 %vm469_vm0, %v2858_v27  ;;  %2787 = vmatmul.mubr.msk.bf16.gmra.mrb[24].mxu1 %vm469_vm0, %v2859_v28 }
  0x37   :  { %2726 = vmatprep.mubr.msk.bf16.mxu0 %vm469_vm0, %v2860_v29  ;;  %2790 = vmatprep.mubr.msk.bf16.mxu1 %vm469_vm0, %v2861_v30 }
  0x3e   :  { %2727 = vmatmul.mubr.msk.bf16.gmra.mrb[28].mxu0 %vm469_vm0, %v2862_v31  ;;  %2791 = vmatmul.mubr.msk.bf16.gmra.mrb[28].mxu1 %vm469_vm0, %v2863_v32 }
  0x3f   :  { %2730 = vmatprep.mubr.msk.bf16.mxu0 %vm469_vm0, %v2864_v33  ;;  %2794 = vmatprep.mubr.msk.bf16.mxu1 %vm469_vm0, %v2865_v34 }
  0x40   :  { %7 = vsyncpa [#allocation3], 0  ;;  %v2866_v35 = vld [vmem:[%s3209_s0 + $0x88] sm:$0xff]   ;;  %v2868_v37 = vld [vmem:[%s3209_s0 + $0x90] sm:$0xff]  }
  0x41   :  { %v2867_v36 = vld [vmem:[%s3209_s0 + $0x188] sm:$0xff]   ;;  %v2869_v38 = vld [vmem:[%s3209_s0 + $0x190] sm:$0xff]   ;;  %v2870_v39 = vld [vmem:[%s3209_s0 + $0x98] sm:$0xff]  }
  0x42   :  { %v2871_v40 = vld [vmem:[%s3209_s0 + $0x198] sm:$0xff]   ;;  %v2872_v41 = vld [vmem:[%s3209_s0 + $0xa0] sm:$0xff]   ;;  %v2874_v43 = vld [vmem:[%s3209_s0 + $0xa8] sm:$0xff]  }
  0x43   :  { %v2873_v42 = vld [vmem:[%s3209_s0 + $0x1a0] sm:$0xff]   ;;  %v2875_v44 = vld [vmem:[%s3209_s0 + $0x1a8] sm:$0xff]   ;;  %v2876_v45 = vld [vmem:[%s3209_s0 + $0xb0] sm:$0xff]  }
  0x44   :  { %v2877_v46 = vld [vmem:[%s3209_s0 + $0x1b0] sm:$0xff]   ;;  %v2878_v47 = vld [vmem:[%s3209_s0 + $0xb8] sm:$0xff]   ;;  %v2880_v49 = vld [vmem:[%s3209_s0 + $0xc0] sm:$0xff]  }
  0x45   :  { %v2879_v48 = vld [vmem:[%s3209_s0 + $0x1b8] sm:$0xff]   ;;  %v2881_v50 = vld [vmem:[%s3209_s0 + $0x1c0] sm:$0xff]   ;;  %v2882_v51 = vld [vmem:[%s3209_s0 + $0xc8] sm:$0xff]  }
  0x46   :  { %2731 = vmatmul.mubr.msk.bf16.gmra.mrb[32].mxu0 %vm469_vm0, %v2866_v35  ;;  %2795 = vmatmul.mubr.msk.bf16.gmra.mrb[32].mxu1 %vm469_vm0, %v2867_v36  ;;  %v2883_v52 = vld [vmem:[%s3209_s0 + $0x1c8] sm:$0xff]   ;;  %v2884_v53 = vld [vmem:[%s3209_s0 + $0xd0] sm:$0xff]   ;;  %v2886_v55 = vld [vmem:[%s3209_s0 + $0xd8] sm:$0xff]  }
  0x47   :  { %2734 = vmatprep.mubr.msk.bf16.mxu0 %vm469_vm0, %v2868_v37  ;;  %2798 = vmatprep.mubr.msk.bf16.mxu1 %vm469_vm0, %v2869_v38  ;;  %v2885_v54 = vld [vmem:[%s3209_s0 + $0x1d0] sm:$0xff]   ;;  %v2887_v56 = vld [vmem:[%s3209_s0 + $0x1d8] sm:$0xff]   ;;  %v2888_v57 = vld [vmem:[%s3209_s0 + $0xe0] sm:$0xff]  }
  0x48   :  { %v2889_v58 = vld [vmem:[%s3209_s0 + $0x1e0] sm:$0xff]   ;;  %v2890_v59 = vld [vmem:[%s3209_s0 + $0xe8] sm:$0xff]   ;;  %v2892_v61 = vld [vmem:[%s3209_s0 + $0xf0] sm:$0xff]  }
  0x49   :  { %v2891_v60 = vld [vmem:[%s3209_s0 + $0x1e8] sm:$0xff]   ;;  %v2893_v62 = vld [vmem:[%s3209_s0 + $0x1f0] sm:$0xff]   ;;  %v2894_v63 = vld [vmem:[%s3209_s0 + $0xf8] sm:$0xff]  }
  0x4a   :  { %v2895_v0 = vld [vmem:[%s3209_s0 + $0x1f8] sm:$0xff]   ;;  %s2920_s0 = smov [#allocation2]  }
  0x4b   :  { %s1852_s22 = sshll.u32 %s2920_s0, 4  ;;  %s1853_s22 = int_to_ptr.vmem [resolvable:$true] %s1852_s22 }
  0x4c   :  { %s2896_s23 = scalar_lea.vmem %s1853_s22, 8192  ;;  %p2901_p1 = scmp.lt.s32.totalorder %s1853_s22, %s1853_s22 }
  0x4d   :  { %p2897_p0 = scmp.ne.s32.totalorder %s1853_s22, %s2896_s23  ;;  %p2902_p2 = scmp.lt.s32.totalorder %s2896_s23, %s2896_s23 }
  0x4e   :  { %2735 = vmatmul.mubr.msk.bf16.gmra.mrb[36].mxu0 %vm469_vm0, %v2870_v39  ;;  %2799 = vmatmul.mubr.msk.bf16.gmra.mrb[36].mxu1 %vm469_vm0, %v2871_v40 }
  0x4f   :  { %2738 = vmatprep.mubr.msk.bf16.mxu0 %vm469_vm0, %v2872_v41  ;;  %2802 = vmatprep.mubr.msk.bf16.mxu1 %vm469_vm0, %v2873_v42  ;;  %p2903_p3 = por %p2902_p2, %p2901_p1 }
  0x51   :  { %p2904_p4 = pnand %p2903_p3, %p2897_p0 }
  0x56   :  { %2739 = vmatmul.mubr.msk.bf16.gmra.mrb[40].mxu0 %vm469_vm0, %v2874_v43  ;;  %2803 = vmatmul.mubr.msk.bf16.gmra.mrb[40].mxu1 %vm469_vm0, %v2875_v44 }
  0x57   :  { %2742 = vmatprep.mubr.msk.bf16.mxu0 %vm469_vm0, %v2876_v45  ;;  %2806 = vmatprep.mubr.msk.bf16.mxu1 %vm469_vm0, %v2877_v46 }
  0x5e   :  { %2743 = vmatmul.mubr.msk.bf16.gmra.mrb[44].mxu0 %vm469_vm0, %v2878_v47  ;;  %2807 = vmatmul.mubr.msk.bf16.gmra.mrb[44].mxu1 %vm469_vm0, %v2879_v48 }
  0x5f   :  { %2746 = vmatprep.mubr.msk.bf16.mxu0 %vm469_vm0, %v2880_v49  ;;  %2810 = vmatprep.mubr.msk.bf16.mxu1 %vm469_vm0, %v2881_v50 }
  0x66   :  { %2747 = vmatmul.mubr.msk.bf16.gmra.mrb[48].mxu0 %vm469_vm0, %v2882_v51  ;;  %2811 = vmatmul.mubr.msk.bf16.gmra.mrb[48].mxu1 %vm469_vm0, %v2883_v52 }
  0x67   :  { %2750 = vmatprep.mubr.msk.bf16.mxu0 %vm469_vm0, %v2884_v53  ;;  %2814 = vmatprep.mubr.msk.bf16.mxu1 %vm469_vm0, %v2885_v54 }
  0x6e   :  { %2751 = vmatmul.mubr.msk.bf16.gmra.mrb[52].mxu0 %vm469_vm0, %v2886_v55  ;;  %2815 = vmatmul.mubr.msk.bf16.gmra.mrb[52].mxu1 %vm469_vm0, %v2887_v56 }
  0x6f   :  { %2754 = vmatprep.mubr.msk.bf16.mxu0 %vm469_vm0, %v2888_v57  ;;  %2818 = vmatprep.mubr.msk.bf16.mxu1 %vm469_vm0, %v2889_v58 }
  0x76   :  { %2755 = vmatmul.mubr.msk.bf16.gmra.mrb[56].mxu0 %vm469_vm0, %v2890_v59  ;;  %2819 = vmatmul.mubr.msk.bf16.gmra.mrb[56].mxu1 %vm469_vm0, %v2891_v60 }
  0x77   :  { %2758 = vmatprep.mubr.msk.bf16.mxu0 %vm469_vm0, %v2892_v61  ;;  %2822 = vmatprep.mubr.msk.bf16.mxu1 %vm469_vm0, %v2893_v62 }
  0x7e   :  { %2759 = vmatmul.mubr.msk.bf16.gmra.mrb[60].mxu0 %vm469_vm0, %v2894_v63  ;;  %2823 = vmatmul.mubr.msk.bf16.gmra.mrb[60].mxu1 %vm469_vm0, %v2895_v0 }
  0xd9   :  { %v2700_v1 = vpop.f32.mrb[0].mxu0  ;;  %v2764_v2 = vpop.f32.mrb[0].mxu1 }
  0xda   :  { %v696_v3 = vpop.f32.mrb[1].mxu0  ;;  %v952_v4 = vpop.f32.mrb[1].mxu1 }
  0xdb   :  { %v2701_v5 = vpop.f32.mrb[2].mxu0  ;;  %v2765_v6 = vpop.f32.mrb[2].mxu1 }
  0xdc   :  { %v2256_v7 = vpack.c.bf16 %v2701_v5, %v2700_v1  ;;  %v2416_v8 = vpack.c.bf16 %v2765_v6, %v2764_v2  ;;  %v699_v9 = vpop.f32.mrb[3].mxu0  ;;  %v955_v10 = vpop.f32.mrb[3].mxu1 }
  0xdd   :  { %v2251_v11 = vpack.c.bf16 %v699_v9, %v696_v3  ;;  %v2411_v12 = vpack.c.bf16 %v955_v10, %v952_v4 }
  0xde   :  { %2568 = vst [vmem:[#allocation2 + $0x8] sm:$0xff] %v2256_v7   ;;  %2600 = vst [vmem:[#allocation2 + $0x108] sm:$0xff] %v2416_v8  }
  0xdf   :  { %2252 = vst [vmem:[#allocation2] sm:$0xff] %v2251_v11   ;;  %2599 = vst [vmem:[#allocation2 + $0x100] sm:$0xff] %v2411_v12  }
  0xe1   :  { %v2704_v13 = vpop.f32.mrb[4].mxu0  ;;  %v2768_v14 = vpop.f32.mrb[4].mxu1 }
  0xe2   :  { %v712_v15 = vpop.f32.mrb[5].mxu0  ;;  %v968_v16 = vpop.f32.mrb[5].mxu1 }
  0xe3   :  { %v2705_v17 = vpop.f32.mrb[6].mxu0  ;;  %v2769_v18 = vpop.f32.mrb[6].mxu1 }
  0xe4   :  { %v2266_v19 = vpack.c.bf16 %v2705_v17, %v2704_v13  ;;  %v2426_v20 = vpack.c.bf16 %v2769_v18, %v2768_v14  ;;  %v715_v21 = vpop.f32.mrb[7].mxu0  ;;  %v971_v22 = vpop.f32.mrb[7].mxu1 }
  0xe5   :  { %v2261_v23 = vpack.c.bf16 %v715_v21, %v712_v15  ;;  %v2421_v24 = vpack.c.bf16 %v971_v22, %v968_v16 }
  0xe6   :  { %2570 = vst [vmem:[#allocation2 + $0x18] sm:$0xff] %v2266_v19   ;;  %2602 = vst [vmem:[#allocation2 + $0x118] sm:$0xff] %v2426_v20  }
  0xe7   :  { %2569 = vst [vmem:[#allocation2 + $0x10] sm:$0xff] %v2261_v23   ;;  %2601 = vst [vmem:[#allocation2 + $0x110] sm:$0xff] %v2421_v24  }
  0xe9   :  { %v2708_v25 = vpop.f32.mrb[8].mxu0  ;;  %v2772_v26 = vpop.f32.mrb[8].mxu1 }
  0xea   :  { %v728_v27 = vpop.f32.mrb[9].mxu0  ;;  %v984_v28 = vpop.f32.mrb[9].mxu1 }
  0xeb   :  { %v2709_v29 = vpop.f32.mrb[10].mxu0  ;;  %v2773_v30 = vpop.f32.mrb[10].mxu1 }
  0xec   :  { %v2276_v31 = vpack.c.bf16 %v2709_v29, %v2708_v25  ;;  %v2436_v32 = vpack.c.bf16 %v2773_v30, %v2772_v26  ;;  %v731_v33 = vpop.f32.mrb[11].mxu0  ;;  %v987_v34 = vpop.f32.mrb[11].mxu1 }
  0xed   :  { %v2271_v35 = vpack.c.bf16 %v731_v33, %v728_v27  ;;  %v2431_v36 = vpack.c.bf16 %v987_v34, %v984_v28 }
  0xee   :  { %2572 = vst [vmem:[#allocation2 + $0x28] sm:$0xff] %v2276_v31   ;;  %2604 = vst [vmem:[#allocation2 + $0x128] sm:$0xff] %v2436_v32  }
  0xef   :  { %2571 = vst [vmem:[#allocation2 + $0x20] sm:$0xff] %v2271_v35   ;;  %2603 = vst [vmem:[#allocation2 + $0x120] sm:$0xff] %v2431_v36  }
  0xf1   :  { %v2712_v37 = vpop.f32.mrb[12].mxu0  ;;  %v2776_v38 = vpop.f32.mrb[12].mxu1 }
  0xf2   :  { %v744_v39 = vpop.f32.mrb[13].mxu0  ;;  %v1000_v40 = vpop.f32.mrb[13].mxu1 }
  0xf3   :  { %v2713_v41 = vpop.f32.mrb[14].mxu0  ;;  %v2777_v42 = vpop.f32.mrb[14].mxu1 }
  0xf4   :  { %v2286_v43 = vpack.c.bf16 %v2713_v41, %v2712_v37  ;;  %v2446_v44 = vpack.c.bf16 %v2777_v42, %v2776_v38  ;;  %v747_v45 = vpop.f32.mrb[15].mxu0  ;;  %v1003_v46 = vpop.f32.mrb[15].mxu1 }
  0xf5   :  { %v2281_v47 = vpack.c.bf16 %v747_v45, %v744_v39  ;;  %v2441_v48 = vpack.c.bf16 %v1003_v46, %v1000_v40 }
  0xf6   :  { %2574 = vst [vmem:[#allocation2 + $0x38] sm:$0xff] %v2286_v43   ;;  %2606 = vst [vmem:[#allocation2 + $0x138] sm:$0xff] %v2446_v44  }
  0xf7   :  { %2573 = vst [vmem:[#allocation2 + $0x30] sm:$0xff] %v2281_v47   ;;  %2605 = vst [vmem:[#allocation2 + $0x130] sm:$0xff] %v2441_v48  }
  0xf9   :  { %v2716_v49 = vpop.f32.mrb[16].mxu0  ;;  %v2780_v50 = vpop.f32.mrb[16].mxu1 }
  0xfa   :  { %v760_v51 = vpop.f32.mrb[17].mxu0  ;;  %v1016_v52 = vpop.f32.mrb[17].mxu1 }
  0xfb   :  { %v2717_v53 = vpop.f32.mrb[18].mxu0  ;;  %v2781_v54 = vpop.f32.mrb[18].mxu1 }
  0xfc   :  { %v2296_v55 = vpack.c.bf16 %v2717_v53, %v2716_v49  ;;  %v2456_v56 = vpack.c.bf16 %v2781_v54, %v2780_v50  ;;  %v763_v57 = vpop.f32.mrb[19].mxu0  ;;  %v1019_v58 = vpop.f32.mrb[19].mxu1 }
  0xfd   :  { %v2291_v59 = vpack.c.bf16 %v763_v57, %v760_v51  ;;  %v2451_v60 = vpack.c.bf16 %v1019_v58, %v1016_v52 }
  0xfe   :  { %2576 = vst [vmem:[#allocation2 + $0x48] sm:$0xff] %v2296_v55   ;;  %2608 = vst [vmem:[#allocation2 + $0x148] sm:$0xff] %v2456_v56  }
  0xff   :  { %2575 = vst [vmem:[#allocation2 + $0x40] sm:$0xff] %v2291_v59   ;;  %2607 = vst [vmem:[#allocation2 + $0x140] sm:$0xff] %v2451_v60  }
 0x101   :  { %v2720_v61 = vpop.f32.mrb[20].mxu0  ;;  %v2784_v62 = vpop.f32.mrb[20].mxu1 }
 0x102   :  { %v776_v63 = vpop.f32.mrb[21].mxu0  ;;  %v1032_v0 = vpop.f32.mrb[21].mxu1 }
 0x103   :  { %v2721_v1 = vpop.f32.mrb[22].mxu0  ;;  %v2785_v2 = vpop.f32.mrb[22].mxu1 }
 0x104   :  { %v2306_v3 = vpack.c.bf16 %v2721_v1, %v2720_v61  ;;  %v2466_v4 = vpack.c.bf16 %v2785_v2, %v2784_v62  ;;  %v779_v5 = vpop.f32.mrb[23].mxu0  ;;  %v1035_v6 = vpop.f32.mrb[23].mxu1 }
 0x105   :  { %v2301_v7 = vpack.c.bf16 %v779_v5, %v776_v63  ;;  %v2461_v8 = vpack.c.bf16 %v1035_v6, %v1032_v0 }
 0x106   :  { %2578 = vst [vmem:[#allocation2 + $0x58] sm:$0xff] %v2306_v3   ;;  %2610 = vst [vmem:[#allocation2 + $0x158] sm:$0xff] %v2466_v4  }
 0x107   :  { %2577 = vst [vmem:[#allocation2 + $0x50] sm:$0xff] %v2301_v7   ;;  %2609 = vst [vmem:[#allocation2 + $0x150] sm:$0xff] %v2461_v8  }
 0x109   :  { %v2724_v9 = vpop.f32.mrb[24].mxu0  ;;  %v2788_v10 = vpop.f32.mrb[24].mxu1 }
 0x10a   :  { %v792_v11 = vpop.f32.mrb[25].mxu0  ;;  %v1048_v12 = vpop.f32.mrb[25].mxu1 }
 0x10b   :  { %v2725_v13 = vpop.f32.mrb[26].mxu0  ;;  %v2789_v14 = vpop.f32.mrb[26].mxu1 }
 0x10c   :  { %v2316_v15 = vpack.c.bf16 %v2725_v13, %v2724_v9  ;;  %v2476_v16 = vpack.c.bf16 %v2789_v14, %v2788_v10  ;;  %v795_v17 = vpop.f32.mrb[27].mxu0  ;;  %v1051_v18 = vpop.f32.mrb[27].mxu1 }
 0x10d   :  { %v2311_v19 = vpack.c.bf16 %v795_v17, %v792_v11  ;;  %v2471_v20 = vpack.c.bf16 %v1051_v18, %v1048_v12 }
 0x10e   :  { %2580 = vst [vmem:[#allocation2 + $0x68] sm:$0xff] %v2316_v15   ;;  %2612 = vst [vmem:[#allocation2 + $0x168] sm:$0xff] %v2476_v16  }
 0x10f   :  { %2579 = vst [vmem:[#allocation2 + $0x60] sm:$0xff] %v2311_v19   ;;  %2611 = vst [vmem:[#allocation2 + $0x160] sm:$0xff] %v2471_v20  }
 0x111   :  { %v2728_v21 = vpop.f32.mrb[28].mxu0  ;;  %v2792_v22 = vpop.f32.mrb[28].mxu1 }
 0x112   :  { %v808_v23 = vpop.f32.mrb[29].mxu0  ;;  %v1064_v24 = vpop.f32.mrb[29].mxu1 }
 0x113   :  { %v2729_v25 = vpop.f32.mrb[30].mxu0  ;;  %v2793_v26 = vpop.f32.mrb[30].mxu1 }
 0x114   :  { %v2326_v27 = vpack.c.bf16 %v2729_v25, %v2728_v21  ;;  %v2486_v28 = vpack.c.bf16 %v2793_v26, %v2792_v22  ;;  %v811_v29 = vpop.f32.mrb[31].mxu0  ;;  %v1067_v30 = vpop.f32.mrb[31].mxu1 }
 0x115   :  { %v2321_v31 = vpack.c.bf16 %v811_v29, %v808_v23  ;;  %v2481_v32 = vpack.c.bf16 %v1067_v30, %v1064_v24 }
 0x116   :  { %2582 = vst [vmem:[#allocation2 + $0x78] sm:$0xff] %v2326_v27   ;;  %2614 = vst [vmem:[#allocation2 + $0x178] sm:$0xff] %v2486_v28  }
 0x117   :  { %2581 = vst [vmem:[#allocation2 + $0x70] sm:$0xff] %v2321_v31   ;;  %2613 = vst [vmem:[#allocation2 + $0x170] sm:$0xff] %v2481_v32  }
 0x119   :  { %v2732_v33 = vpop.f32.mrb[32].mxu0  ;;  %v2796_v34 = vpop.f32.mrb[32].mxu1 }
 0x11a   :  { %v824_v35 = vpop.f32.mrb[33].mxu0  ;;  %v1080_v36 = vpop.f32.mrb[33].mxu1 }
 0x11b   :  { %v2733_v37 = vpop.f32.mrb[34].mxu0  ;;  %v2797_v38 = vpop.f32.mrb[34].mxu1 }
 0x11c   :  { %v2336_v39 = vpack.c.bf16 %v2733_v37, %v2732_v33  ;;  %v2496_v40 = vpack.c.bf16 %v2797_v38, %v2796_v34  ;;  %v827_v41 = vpop.f32.mrb[35].mxu0  ;;  %v1083_v42 = vpop.f32.mrb[35].mxu1 }
 0x11d   :  { %v2331_v43 = vpack.c.bf16 %v827_v41, %v824_v35  ;;  %v2491_v44 = vpack.c.bf16 %v1083_v42, %v1080_v36 }
 0x11e   :  { %2584 = vst [vmem:[#allocation2 + $0x88] sm:$0xff] %v2336_v39   ;;  %2616 = vst [vmem:[#allocation2 + $0x188] sm:$0xff] %v2496_v40  }
 0x11f   :  { %2583 = vst [vmem:[#allocation2 + $0x80] sm:$0xff] %v2331_v43   ;;  %2615 = vst [vmem:[#allocation2 + $0x180] sm:$0xff] %v2491_v44  }
 0x121   :  { %v2736_v45 = vpop.f32.mrb[36].mxu0  ;;  %v2800_v46 = vpop.f32.mrb[36].mxu1 }
 0x122   :  { %v840_v47 = vpop.f32.mrb[37].mxu0  ;;  %v1096_v48 = vpop.f32.mrb[37].mxu1 }
 0x123   :  { %v2737_v49 = vpop.f32.mrb[38].mxu0  ;;  %v2801_v50 = vpop.f32.mrb[38].mxu1 }
 0x124   :  { %v2346_v51 = vpack.c.bf16 %v2737_v49, %v2736_v45  ;;  %v2506_v52 = vpack.c.bf16 %v2801_v50, %v2800_v46  ;;  %v843_v53 = vpop.f32.mrb[39].mxu0  ;;  %v1099_v54 = vpop.f32.mrb[39].mxu1 }
 0x125   :  { %v2341_v55 = vpack.c.bf16 %v843_v53, %v840_v47  ;;  %v2501_v56 = vpack.c.bf16 %v1099_v54, %v1096_v48 }
 0x126   :  { %2586 = vst [vmem:[#allocation2 + $0x98] sm:$0xff] %v2346_v51   ;;  %2618 = vst [vmem:[#allocation2 + $0x198] sm:$0xff] %v2506_v52  }
 0x127   :  { %2585 = vst [vmem:[#allocation2 + $0x90] sm:$0xff] %v2341_v55   ;;  %2617 = vst [vmem:[#allocation2 + $0x190] sm:$0xff] %v2501_v56  }
 0x129   :  { %v2740_v57 = vpop.f32.mrb[40].mxu0  ;;  %v2804_v58 = vpop.f32.mrb[40].mxu1 }
 0x12a   :  { %v856_v59 = vpop.f32.mrb[41].mxu0  ;;  %v1112_v60 = vpop.f32.mrb[41].mxu1 }
 0x12b   :  { %v2741_v61 = vpop.f32.mrb[42].mxu0  ;;  %v2805_v62 = vpop.f32.mrb[42].mxu1 }
 0x12c   :  { %v2356_v63 = vpack.c.bf16 %v2741_v61, %v2740_v57  ;;  %v2516_v0 = vpack.c.bf16 %v2805_v62, %v2804_v58  ;;  %v859_v1 = vpop.f32.mrb[43].mxu0  ;;  %v1115_v2 = vpop.f32.mrb[43].mxu1 }
 0x12d   :  { %v2351_v3 = vpack.c.bf16 %v859_v1, %v856_v59  ;;  %v2511_v4 = vpack.c.bf16 %v1115_v2, %v1112_v60 }
 0x12e   :  { %2588 = vst [vmem:[#allocation2 + $0xa8] sm:$0xff] %v2356_v63   ;;  %2620 = vst [vmem:[#allocation2 + $0x1a8] sm:$0xff] %v2516_v0  }
 0x12f   :  { %2587 = vst [vmem:[#allocation2 + $0xa0] sm:$0xff] %v2351_v3   ;;  %2619 = vst [vmem:[#allocation2 + $0x1a0] sm:$0xff] %v2511_v4  }
 0x131   :  { %v2744_v5 = vpop.f32.mrb[44].mxu0  ;;  %v2808_v6 = vpop.f32.mrb[44].mxu1 }
 0x132   :  { %v872_v7 = vpop.f32.mrb[45].mxu0  ;;  %v1128_v8 = vpop.f32.mrb[45].mxu1 }
 0x133   :  { %v2745_v9 = vpop.f32.mrb[46].mxu0  ;;  %v2809_v10 = vpop.f32.mrb[46].mxu1 }
 0x134   :  { %v2366_v11 = vpack.c.bf16 %v2745_v9, %v2744_v5  ;;  %v2526_v12 = vpack.c.bf16 %v2809_v10, %v2808_v6  ;;  %v875_v13 = vpop.f32.mrb[47].mxu0  ;;  %v1131_v14 = vpop.f32.mrb[47].mxu1 }
 0x135   :  { %v2361_v15 = vpack.c.bf16 %v875_v13, %v872_v7  ;;  %v2521_v16 = vpack.c.bf16 %v1131_v14, %v1128_v8 }
 0x136   :  { %2590 = vst [vmem:[#allocation2 + $0xb8] sm:$0xff] %v2366_v11   ;;  %2622 = vst [vmem:[#allocation2 + $0x1b8] sm:$0xff] %v2526_v12  }
 0x137   :  { %2589 = vst [vmem:[#allocation2 + $0xb0] sm:$0xff] %v2361_v15   ;;  %2621 = vst [vmem:[#allocation2 + $0x1b0] sm:$0xff] %v2521_v16  }
 0x139   :  { %v2748_v17 = vpop.f32.mrb[48].mxu0  ;;  %v2812_v18 = vpop.f32.mrb[48].mxu1 }
 0x13a   :  { %v888_v19 = vpop.f32.mrb[49].mxu0  ;;  %v1144_v20 = vpop.f32.mrb[49].mxu1 }
 0x13b   :  { %v2749_v21 = vpop.f32.mrb[50].mxu0  ;;  %v2813_v22 = vpop.f32.mrb[50].mxu1 }
 0x13c   :  { %v2376_v23 = vpack.c.bf16 %v2749_v21, %v2748_v17  ;;  %v2536_v24 = vpack.c.bf16 %v2813_v22, %v2812_v18  ;;  %v891_v25 = vpop.f32.mrb[51].mxu0  ;;  %v1147_v26 = vpop.f32.mrb[51].mxu1 }
 0x13d   :  { %v2371_v27 = vpack.c.bf16 %v891_v25, %v888_v19  ;;  %v2531_v28 = vpack.c.bf16 %v1147_v26, %v1144_v20 }
 0x13e   :  { %2592 = vst [vmem:[#allocation2 + $0xc8] sm:$0xff] %v2376_v23   ;;  %2624 = vst [vmem:[#allocation2 + $0x1c8] sm:$0xff] %v2536_v24  }
 0x13f   :  { %2591 = vst [vmem:[#allocation2 + $0xc0] sm:$0xff] %v2371_v27   ;;  %2623 = vst [vmem:[#allocation2 + $0x1c0] sm:$0xff] %v2531_v28  }
 0x141   :  { %v2752_v29 = vpop.f32.mrb[52].mxu0  ;;  %v2816_v30 = vpop.f32.mrb[52].mxu1 }
 0x142   :  { %v904_v31 = vpop.f32.mrb[53].mxu0  ;;  %v1160_v32 = vpop.f32.mrb[53].mxu1 }
 0x143   :  { %v2753_v33 = vpop.f32.mrb[54].mxu0  ;;  %v2817_v34 = vpop.f32.mrb[54].mxu1 }
 0x144   :  { %v2386_v35 = vpack.c.bf16 %v2753_v33, %v2752_v29  ;;  %v2546_v36 = vpack.c.bf16 %v2817_v34, %v2816_v30  ;;  %v907_v37 = vpop.f32.mrb[55].mxu0  ;;  %v1163_v38 = vpop.f32.mrb[55].mxu1 }
 0x145   :  { %v2381_v39 = vpack.c.bf16 %v907_v37, %v904_v31  ;;  %v2541_v40 = vpack.c.bf16 %v1163_v38, %v1160_v32 }
 0x146   :  { %2594 = vst [vmem:[#allocation2 + $0xd8] sm:$0xff] %v2386_v35   ;;  %2626 = vst [vmem:[#allocation2 + $0x1d8] sm:$0xff] %v2546_v36  }
 0x147   :  { %2593 = vst [vmem:[#allocation2 + $0xd0] sm:$0xff] %v2381_v39   ;;  %2625 = vst [vmem:[#allocation2 + $0x1d0] sm:$0xff] %v2541_v40  }
 0x149   :  { %v2756_v41 = vpop.f32.mrb[56].mxu0  ;;  %v2820_v42 = vpop.f32.mrb[56].mxu1 }
 0x14a   :  { %v920_v43 = vpop.f32.mrb[57].mxu0  ;;  %v1176_v44 = vpop.f32.mrb[57].mxu1 }
 0x14b   :  { %v2757_v45 = vpop.f32.mrb[58].mxu0  ;;  %v2821_v46 = vpop.f32.mrb[58].mxu1 }
 0x14c   :  { %v2396_v47 = vpack.c.bf16 %v2757_v45, %v2756_v41  ;;  %v2556_v48 = vpack.c.bf16 %v2821_v46, %v2820_v42  ;;  %v923_v49 = vpop.f32.mrb[59].mxu0  ;;  %v1179_v50 = vpop.f32.mrb[59].mxu1 }
 0x14d   :  { %v2391_v51 = vpack.c.bf16 %v923_v49, %v920_v43  ;;  %v2551_v52 = vpack.c.bf16 %v1179_v50, %v1176_v44 }
 0x14e   :  { %2596 = vst [vmem:[#allocation2 + $0xe8] sm:$0xff] %v2396_v47   ;;  %2628 = vst [vmem:[#allocation2 + $0x1e8] sm:$0xff] %v2556_v48  }
 0x14f   :  { %2595 = vst [vmem:[#allocation2 + $0xe0] sm:$0xff] %v2391_v51   ;;  %2627 = vst [vmem:[#allocation2 + $0x1e0] sm:$0xff] %v2551_v52  }
 0x151   :  { %v2760_v53 = vpop.f32.mrb[60].mxu0  ;;  %v2824_v54 = vpop.f32.mrb[60].mxu1 }
 0x152   :  { %v936_v55 = vpop.f32.mrb[61].mxu0  ;;  %v1192_v56 = vpop.f32.mrb[61].mxu1 }
 0x153   :  { %v2761_v57 = vpop.f32.mrb[62].mxu0  ;;  %v2825_v58 = vpop.f32.mrb[62].mxu1 }
 0x154   :  { %v2406_v59 = vpack.c.bf16 %v2761_v57, %v2760_v53  ;;  %v2566_v60 = vpack.c.bf16 %v2825_v58, %v2824_v54  ;;  %v939_v61 = vpop.f32.mrb[63].mxu0  ;;  %v1195_v62 = vpop.f32.mrb[63].mxu1 }
 0x155   :  { %v2401_v63 = vpack.c.bf16 %v939_v61, %v936_v55  ;;  %v2561_v0 = vpack.c.bf16 %v1195_v62, %v1192_v56 }
 0x156   :  { %2598 = vst [vmem:[#allocation2 + $0xf8] sm:$0xff] %v2406_v59   ;;  %2630 = vst [vmem:[#allocation2 + $0x1f8] sm:$0xff] %v2566_v60  }
 0x157   :  { %2597 = vst [vmem:[#allocation2 + $0xf0] sm:$0xff] %v2401_v63   ;;  %2629 = vst [vmem:[#allocation2 + $0x1f0] sm:$0xff] %v2561_v0  }
 0x158   :  { %2907 = shalt.err (!%p2904_p4)
}
 0x159   :  { %s2908_s26 = scalar_lea.hbm %s3211_s2, 8192 }
 0x15a   :  { %p2909_p5 = scmp.ne.s32.totalorder %s3211_s2, %s2908_s26  ;;  %p2912_p6 = scmp.lt.u32.totalorder %s2908_s26, %s3211_s2 }
 0x15c   :  { %p2914_p7 = pnand %p2912_p6, %p2909_p5 }
 0x15e   :  { %2917 = shalt.err (!%p2914_p7)
}
 0x15f   :  { %s2921_s3 = smov 64   ;;  %s2922_s4 = smov 4  }
 0x160   :  { %1858 = dma.vmem_to_hbm [thread:$0]  %s1853_s22, 8192, %s3211_s2, [#allocation3], %s2921_s3, %s2921_s3, %s2922_s4  }
 0x161   :  { %2918 = dma.done.wait [#allocation3], 8192  }
 0x162   :  { %2919 = vsyncadd [#allocation3], 4294959104 }
 0x163   :  { %1862 = vsyncpa [#allocation3], 1 }

</bundles_post_ra>
